<compile_context>
chip_gen: v7x
topology: tpu7x:2x2x1
jax: 0.10.0
libtpu: 0.0.40
codegen_flags: <defaults>
</compile_context>

<pallas_src>
import jax
import jax.numpy as jnp
from jax.experimental import pallas as pl
from jax.experimental.pallas import tpu as pltpu


def _make_fm_kernel(field_size: int, emb_size: int):
    """Build the FM kernel for a static (field_size, embedding_size)."""

    def kernel(x_ref, o_ref):
        # x_ref: (TB, F*E) block in VMEM, o_ref: (1, TB) lane-dense output.
        tb = x_ref.shape[0]
        acc_sum = jnp.zeros((tb, emb_size), jnp.float32)   # sum_f x
        acc_sq = jnp.zeros((tb, emb_size), jnp.float32)    # sum_f x^2

        # Single fused pass over the tile: statically unrolled over the
        # (small) field dimension, one chunk of width E per field.
        for f in range(field_size):
            xf = x_ref[:, f * emb_size:(f + 1) * emb_size].astype(jnp.float32)
            acc_sum = acc_sum + xf
            acc_sq = acc_sq + xf * xf

        cross = acc_sum * acc_sum - acc_sq                 # (TB, E)
        out = 0.5 * jnp.sum(cross, axis=1)                 # (TB,)
        o_ref[...] = out[None, :].astype(o_ref.dtype)

    return kernel


def fm_forward(x: jax.Array) -> jax.Array:
    """FM second-order cross-feature reduction.

    Args:
        x: [batch_size, field_size, embedding_size]
    Returns:
        [batch_size, 1] in the input dtype (f32 accumulation internally).
    """
    B, F, E = x.shape
    FE = F * E
    itemsize = jnp.dtype(x.dtype).itemsize

    # Flatten trailing dims (row-major contiguous -> free reshape) so VMEM
    # tiles are (8,128)-dense regardless of how small F / E are.
    x2d = x.reshape(B, FE)

    # Batch tile size: largest multiple of 128 whose input block stays under
    # ~4 MiB (double-buffered => ~8 MiB), comfortably inside the default
    # scoped VMEM on v5e/v6e/v7x while leaving headroom for f32 temps.
    _BLOCK_BYTES = 4 * 1024 * 1024
    rows = max(1, _BLOCK_BYTES // max(1, FE * itemsize))
    tb = max(128, (rows // 128) * 128)
    if B <= tb:
        tb = B  # single block; block dims equal the full array dims.
    grid = (pl.cdiv(B, tb),)

    cost = pl.CostEstimate(
        flops=3 * B * FE,
        transcendentals=0,
        bytes_accessed=B * FE * itemsize + B * itemsize,
    )

    out = pl.pallas_call(
        _make_fm_kernel(F, E),
        out_shape=jax.ShapeDtypeStruct((1, B), x.dtype),
        grid=grid,
        in_specs=[pl.BlockSpec((tb, FE), lambda i: (i, 0))],
        out_specs=pl.BlockSpec((1, tb), lambda i: (0, i)),
        compiler_params=pltpu.CompilerParams(
            dimension_semantics=("parallel",),
        ),
        cost_estimate=cost,
    )(x2d)

    return out.reshape(B, 1)


def _fm_ref(x: jax.Array) -> jax.Array:
    """Pure-JAX reference matching the PyTorch forward exactly."""
    square_of_sum = jnp.sum(x, axis=1) ** 2
    sum_of_square = jnp.sum(x ** 2, axis=1)
    cross_term = 0.5 * (square_of_sum - sum_of_square)
    return jnp.sum(cross_term, axis=1, keepdims=True)


if __name__ == "__main__":
    key = jax.random.PRNGKey(0)

    # Small shape consistent with the module: [batch, field, embedding].
    batch, field, emb = 2, 4, 32
    x = jax.random.normal(key, (batch, field, emb), dtype=jnp.float32)

    out = fm_forward(x)
    out = jax.block_until_ready(out)
    ref = _fm_ref(x)
    assert out.shape == (batch, 1), out.shape
    assert jnp.allclose(out, ref, atol=1e-5, rtol=1e-5), (out, ref)

    # Second check: batch large enough to exercise the tiled / pipelined
    # path with a partial last block (grid > 1).
    key2 = jax.random.PRNGKey(0)
    batch2 = 9000
    x2 = jax.random.normal(key2, (batch2, field, emb), dtype=jnp.float32)
    out2 = jax.block_until_ready(fm_forward(x2))
    ref2 = _fm_ref(x2)
    assert out2.shape == (batch2, 1), out2.shape
    assert jnp.allclose(out2, ref2, atol=1e-4, rtol=1e-4)

    print("KERNEL_OK")
</pallas_src>

<mosaic_0001>
module attributes {stable_mosaic.version = 11 : i64} {
  func.func @kernel(%arg0: i32, %arg1: memref<2x128xf32, #tpu.memory_space<vmem>>, %arg2: memref<1x2xf32, #tpu.memory_space<vmem>>) attributes {dimension_semantics = [#tpu.dimension_semantics<parallel>], iteration_bounds = array<i64: 1>, scalar_prefetch = 0 : i64, scratch_operands = 0 : i64, tpu.core_type = #tpu.core_type<tc>, window_params = [{transform_indices = @transform_0, window_bounds = array<i64: 2, 128>}, {transform_indices = @transform_1, window_bounds = array<i64: 1, 2>}]} {
    %cst = arith.constant 0.000000e+00 : f32
    %0 = vector.broadcast %cst : f32 to vector<2x32xf32>
    %cst_0 = arith.constant 0.000000e+00 : f32
    %1 = vector.broadcast %cst_0 : f32 to vector<2x32xf32>
    %c0 = arith.constant 0 : index
    %c0_1 = arith.constant 0 : index
    %2 = vector.load %arg1[%c0, %c0_1] : memref<2x128xf32, #tpu.memory_space<vmem>>, vector<2x32xf32>
    %3 = arith.addf %0, %2 : vector<2x32xf32>
    %4 = arith.mulf %2, %2 : vector<2x32xf32>
    %5 = arith.addf %1, %4 : vector<2x32xf32>
    %c0_2 = arith.constant 0 : index
    %c32 = arith.constant 32 : index
    %6 = vector.load %arg1[%c0_2, %c32] : memref<2x128xf32, #tpu.memory_space<vmem>>, vector<2x32xf32>
    %7 = arith.addf %3, %6 : vector<2x32xf32>
    %8 = arith.mulf %6, %6 : vector<2x32xf32>
    %9 = arith.addf %5, %8 : vector<2x32xf32>
    %c0_3 = arith.constant 0 : index
    %c64 = arith.constant 64 : index
    %10 = vector.load %arg1[%c0_3, %c64] : memref<2x128xf32, #tpu.memory_space<vmem>>, vector<2x32xf32>
    %11 = arith.addf %7, %10 : vector<2x32xf32>
    %12 = arith.mulf %10, %10 : vector<2x32xf32>
    %13 = arith.addf %9, %12 : vector<2x32xf32>
    %c0_4 = arith.constant 0 : index
    %c96 = arith.constant 96 : index
    %14 = vector.load %arg1[%c0_4, %c96] : memref<2x128xf32, #tpu.memory_space<vmem>>, vector<2x32xf32>
    %15 = arith.addf %11, %14 : vector<2x32xf32>
    %16 = arith.mulf %14, %14 : vector<2x32xf32>
    %17 = arith.addf %13, %16 : vector<2x32xf32>
    %18 = arith.mulf %15, %15 : vector<2x32xf32>
    %19 = arith.subf %18, %17 : vector<2x32xf32>
    %cst_5 = arith.constant dense<0.000000e+00> : vector<2xf32>
    %20 = vector.multi_reduction <add>, %19, %cst_5 [1] : vector<2x32xf32> to vector<2xf32>
    %cst_6 = arith.constant 5.000000e-01 : f32
    %21 = vector.broadcast %cst_6 : f32 to vector<2xf32>
    %22 = arith.mulf %21, %20 : vector<2xf32>
    %23 = vector.shape_cast %22 : vector<2xf32> to vector<1x2xf32>
    %c0_7 = arith.constant 0 : index
    %c0_8 = arith.constant 0 : index
    %24 = vector.load %arg2[%c0_7, %c0_8] : memref<1x2xf32, #tpu.memory_space<vmem>>, vector<1x2xf32>
    tpu.vector_store %arg2[%c0_7, %c0_8], %23 {strides = array<i32>} : memref<1x2xf32, #tpu.memory_space<vmem>>, vector<1x2xf32>,
    return
  }
  func.func @transform_0(%arg0: i32) -> (i32, i32) {
    %c0_i32 = arith.constant 0 : i32
    %c0_i32_0 = arith.constant 0 : i32
    return %arg0, %c0_i32 : i32, i32
  }
  func.func @transform_1(%arg0: i32) -> (i32, i32) {
    %c0_i32 = arith.constant 0 : i32
    %c0_i32_0 = arith.constant 0 : i32
    return %c0_i32, %arg0 : i32, i32
  }
}

</mosaic_0001>

<bundles_post_ra>
// kernel: tpu_custom_call.1
= control target key start
LH: loop header
LB: loop body
LE: loop exit
PB: predicated region body
PF: predicated region fallthrough
CT: control target
= control target key end

     0   :  { %6 = vsyncpa [#allocation3], 0  ;;  %s175_s0 = inlined_call_operand.hbm [shape: f32[2,128], index: 0, kind: input, shape index: {}]   ;;  %s176_s1 = inlined_call_operand.hbm [shape: f32[1,2], index: 1, kind: output, shape index: {}]  }
   0x1   :  { %7 = vsyncpa [#allocation4], 0  ;;  %s136_s6 = smov [#allocation2]   ;;  %s88_s10 = scalar_lea.hbm %s175_s0, 32 }
   0x2   :  { %s14_s7 = sshll.u32 %s136_s6, 4  ;;  %p89_p0 = scmp.ne.s32.totalorder %s175_s0, %s88_s10  ;;  %s15_s7 = int_to_ptr.vmem [resolvable:$true] %s14_s7 }
   0x3   :  { %p92_p1 = scmp.lt.u32.totalorder %s88_s10, %s175_s0 }
   0x5   :  { %p94_p2 = pnand %p92_p1, %p89_p0 }
   0x7   :  { %97 = shalt.err (!%p94_p2)
}
   0x8   :  { %s98_s15 = scalar_lea.vmem %s15_s7, 32  ;;  %p103_p4 = scmp.lt.s32.totalorder %s15_s7, %s15_s7 }
   0x9   :  { %p99_p3 = scmp.ne.s32.totalorder %s15_s7, %s98_s15  ;;  %p104_p5 = scmp.lt.s32.totalorder %s98_s15, %s98_s15 }
   0xb   :  { %p105_p6 = por %p104_p5, %p103_p4 }
   0xd   :  { %p106_p7 = pnand %p105_p6, %p99_p3 }
   0xf   :  { %109 = shalt.err (!%p106_p7)
}
  0x10   :  { %17 = dma.hbm_to_vmem [thread:$0]  %s175_s0, 32, %s15_s7, [#allocation3]  }
  0x11   :  { %132 = dma.done.wait [#allocation3], 32  }
  0x12   :  { %133 = vsyncadd [#allocation3], 4294967264  ;;  %v21_v0 = vld [vmem:[#allocation2] sm:$0x3]  ;;  %s137_s18 = smov 64   ;;  %s138_s19 = smov 96   ;;  %v59_v17 = vlaneseq }
  0x13   :  { %35 = vrot.lane.b32.xlu1 %v21_v0, %s137_s18  ;;  %26 = vrot.lane.b32.xlu0 %v21_v0, %s138_s19  ;;  %v23_v1 = vmul.f32 %v21_v0, %v21_v0  ;;  %s139_s20 = smov 32   ;;  %vm53_vm0 = vcmask 254976   ;;  %s140_s0 = smov [#allocation5]   ;;  %vm66_vm1 = vcmask 8192  }
  0x14   :  { %v60_v18 = vand.u32 127, %v59_v17  ;;  %v62_v19 = vshrl.u32 %v59_v17, 7  ;;  %s74_s21 = sshll.u32 %s140_s0, 4  ;;  %s75_s21 = int_to_ptr.vmem [resolvable:$true] %s74_s21 }
  0x15   :  { %s110_s22 = scalar_lea.vmem %s75_s21, 16  ;;  %s114_s23 = scalar_lea.vmem %s75_s21, 32 }
  0x16   :  { %v63_v20 = vsub.s32 %v60_v18, %v62_v19  ;;  %p111_p8 = scmp.ne.s32.totalorder %s75_s21, %s110_s22  ;;  %p115_p9 = scmp.lt.s32.totalorder %s75_s21, %s75_s21 }
  0x17   :  { %39 = vrot.lane.b32.xlu1 %v23_v1, %s137_s18  ;;  %31 = vrot.lane.b32.xlu0 %v23_v1, %s138_s19  ;;  %p116_p10 = scmp.lt.s32.totalorder %s114_s23, %s110_s22 }
  0x19   :  { %p117_p11 = por %p116_p10, %p115_p9 }
  0x1b   :  { %47 = vrot.lane.b32.xlu1 %v23_v1, %s139_s20  ;;  %43 = vrot.lane.b32.xlu0 %v21_v0, %s139_s20  ;;  %p118_p12 = pnand %p117_p11, %p111_p8 }
  0x85   :  { %v36_v2 = vpop.permute.xlu1 %35  ;;  %v27_v3 = vpop.permute.xlu0 %26 }
  0x86   :  { %v29_v4 = vadd.f32 %v27_v3, %v21_v0 }
  0x88   :  { %v38_v9 = vadd.f32 %v36_v2, %v29_v4 }
  0x89   :  { %v40_v5 = vpop.permute.xlu1 %39  ;;  %v32_v6 = vpop.permute.xlu0 %31 }
  0x8a   :  { %v34_v7 = vadd.f32 %v32_v6, %v23_v1 }
  0x8c   :  { %v42_v8 = vadd.f32 %v40_v5, %v34_v7 }
  0x8d   :  { %v48_v10 = vpop.permute.xlu1 %47  ;;  %v44_v11 = vpop.permute.xlu0 %43 }
  0x8e   :  { %v46_v12 = vadd.f32 %v44_v11, %v38_v9  ;;  %v50_v13 = vadd.f32 %v48_v10, %v42_v8 }
  0x90   :  { %v51_v14 = vmul.f32 %v46_v12, %v46_v12 }
  0x92   :  { %v52_v15 = vsub.f32 %v51_v14, %v50_v13 }
  0x94   :  { %v54_v16 = vsel %vm53_vm0, %v52_v15, 0.0 }
  0x95   :  { %55 = vadd.xlane.f32.xlu0 %v54_v16 }
 0x122   :  { %v56_v21 = vpop.xlane.xlu0 %55 }
 0x123   :  { %v57_v22 = vmul.f32 0.5, %v56_v21 }
 0x125   :  { %v64_v23 = vrot.slane %v57_v22, %v63_v20 }
 0x127   :  { %67 = vst.msk [vmem:[#allocation5] sm:$0x1] %vm66_vm1, %v64_v23 }
 0x128   :  { %121 = shalt.err (!%p118_p12)
}
 0x129   :  { %s122_s26 = scalar_lea.hbm %s176_s1, 16 }
 0x12a   :  { %p123_p13 = scmp.ne.s32.totalorder %s176_s1, %s122_s26  ;;  %p126_p0 = scmp.lt.u32.totalorder %s122_s26, %s176_s1 }
 0x12c   :  { %p128_p1 = pnand %p126_p0, %p123_p13 }
 0x12e   :  { %131 = shalt.err (!%p128_p1)
}
 0x12f   :  { %77 = dma.vmem_to_hbm [thread:$0]  %s75_s21, 16, %s176_s1, [#allocation4]  }
 0x130   :  { %134 = dma.done.wait [#allocation4], 16  }
 0x131   :  { %135 = vsyncadd [#allocation4], 4294967280 }
 0x132   :  { %81 = vsyncpa [#allocation3], 1 }
 0x133   :  { %82 = vsyncpa [#allocation4], 1 }

</bundles_post_ra>
